<compile_context>
chip_gen: v5e
topology: v5e:2x2
jax: 0.10.0
libtpu: 0.0.40
codegen_flags: <defaults>
</compile_context>

<pallas_src>
import jax
import jax.numpy as jnp
from jax.experimental import pallas as pl
from jax.experimental.pallas import tpu as pltpu


def _mlp_kernel(x_ref, w1_ref, b1_ref, w2_ref, b2_ref, w3_ref, b3_ref, o_ref):
    # Whole (small) MLP fused per batch tile: MXU dots with f32 accumulation;
    # bias add + ReLU stay f32 on the VPU.  x arrives f32 and is cast to the
    # compute dtype here (free under the dominant DMA).
    cdt = w1_ref.dtype
    x = x_ref[...].astype(cdt)
    h = jnp.dot(x, w1_ref[...], preferred_element_type=jnp.float32)
    h = jnp.maximum(h + b1_ref[...], 0.0)
    h = jnp.dot(h.astype(cdt), w2_ref[...], preferred_element_type=jnp.float32)
    h = jnp.maximum(h + b2_ref[...], 0.0)
    out = jnp.dot(h.astype(cdt), w3_ref[...], preferred_element_type=jnp.float32)
    o_ref[...] = (out + b3_ref[...]).astype(o_ref.dtype)


def mlp_reference(x, params, use_bf16=True):
    """Pure-JAX reference with the same numerics as the kernel (bf16 dots, f32 acc).

    Also serves as the fused-XLA fallback path for tiny batches."""
    cdt = jnp.bfloat16 if use_bf16 else jnp.float32
    (w1, b1), (w2, b2), (w3, b3) = params
    h = jnp.dot(x.astype(cdt), w1.astype(cdt), preferred_element_type=jnp.float32)
    h = jnp.maximum(h + b1, 0.0)
    h = jnp.dot(h.astype(cdt), w2.astype(cdt), preferred_element_type=jnp.float32)
    h = jnp.maximum(h + b2, 0.0)
    out = jnp.dot(h.astype(cdt), w3.astype(cdt), preferred_element_type=jnp.float32)
    return out + b3


def mlp_forward(x, params, t=0, flag=False, *, block_batch=4096, use_bf16=True,
                min_pallas_batch=512, force_pallas=False):
    """Pallas forward for Net: x [B, n_inputs] -> logits [B, n_outputs] (f32)."""
    del t, flag  # not used by the dense forward path
    (w1, b1), (w2, b2), (w3, b3) = params
    B, n_in = x.shape
    n_hid = w1.shape[1]
    n_out = w3.shape[1]

    # Tiny batches (the module's usual single-sample getBatch calls): the
    # pallas_call fixed cost dwarfs the math; fused XLA is strictly faster.
    if B < min_pallas_batch and not force_pallas:
        return mlp_reference(x.astype(jnp.float32), params, use_bf16=use_bf16)

    # Weights/biases cast once in the wrapper (tiny, VMEM-resident); x stays
    # f32 in HBM and is cast in-kernel.
    cdt = jnp.bfloat16 if use_bf16 else jnp.float32
    xk = x.astype(jnp.float32)
    w1k, w2k, w3k = (w.astype(cdt) for w in (w1, w2, w3))
    b1k, b2k, b3k = (b.astype(jnp.float32) for b in (b1, b2, b3))

    # Batch tile: large (amortizes per-step overhead), sublane-aligned, and
    # capped at ~B/2 so the grid has >= 2 "parallel" steps -> both v7x
    # TensorCores get work (costs nothing on single-TC v5e/v6e).
    sub = 8
    half = ((pl.cdiv(B, 2) + sub - 1) // sub) * sub
    tb = max(sub, min(block_batch, half))
    grid = (pl.cdiv(B, tb),)

    stream_spec = lambda shape: pl.BlockSpec(shape, lambda i: (i, 0))
    resident_spec = lambda shape: pl.BlockSpec(shape, lambda i: (0, 0))

    flops = 2 * B * (n_in * n_hid + n_hid * n_hid + n_hid * n_out)
    bytes_accessed = (
        B * (n_in * xk.dtype.itemsize + n_out * 4)
        + sum(int(a.size) * a.dtype.itemsize
              for a in (w1k, b1k, w2k, b2k, w3k, b3k))
    )

    out = pl.pallas_call(
        _mlp_kernel,
        out_shape=jax.ShapeDtypeStruct((B, n_out), jnp.float32),
        grid=grid,
        in_specs=[
            stream_spec((tb, n_in)),                         # streamed per step
            resident_spec(w1k.shape), resident_spec(b1k.shape),  # VMEM-resident
            resident_spec(w2k.shape), resident_spec(b2k.shape),
            resident_spec(w3k.shape), resident_spec(b3k.shape),
        ],
        out_specs=stream_spec((tb, n_out)),   # narrow (n_out) block: last dim ==
                                              # full array dim, so layout is legal;
                                              # masked stores but ~12x fewer bytes.
        compiler_params=pltpu.CompilerParams(
            dimension_semantics=("parallel",)),
        cost_estimate=pl.CostEstimate(
            flops=flops, transcendentals=0, bytes_accessed=bytes_accessed),
    )(xk, w1k, b1k, w2k, b2k, w3k, b3k)

    return out


def init_params(key, sizes):
    """Deterministic init mirroring nn.Linear's U(-1/sqrt(fan_in), 1/sqrt(fan_in)).

    Weights stored as [in, out]; biases stored as [1, out] (2D for TPU layout).
    """
    params = []
    for fan_in, fan_out in zip(sizes[:-1], sizes[1:]):
        key, kw, kb = jax.random.split(key, 3)
        bound = 1.0 / jnp.sqrt(jnp.float32(fan_in))
        w = jax.random.uniform(kw, (fan_in, fan_out), jnp.float32, -bound, bound)
        b = jax.random.uniform(kb, (1, fan_out), jnp.float32, -bound, bound)
        params.append((w, b))
    return params


if __name__ == "__main__":
    # Shapes consistent with the module:
    #   n_inputs=32, n_layers=2, n_hiddens=32, n_outputs=10, batch=2
    n_inputs, n_hiddens, n_layers, n_outputs = 32, 32, 2, 10
    sizes = [n_inputs] + [n_hiddens] * n_layers + [n_outputs]

    key = jax.random.PRNGKey(0)
    key, kx = jax.random.split(key)
    params = init_params(key, sizes)

    # --- tiny batch (module's getBatch-style call) -> fused-XLA fallback ----
    batch = 2
    x = jax.random.normal(kx, (batch, n_inputs), jnp.float32)
    out = jax.block_until_ready(mlp_forward(x, params, t=0, flag=False))
    assert out.shape == (batch, n_outputs)
    ref = mlp_reference(x, params, use_bf16=True)
    assert jnp.allclose(out, ref, atol=1e-3, rtol=1e-3), "fallback path mismatch"
    ref_f32 = mlp_reference(x, params, use_bf16=False)
    assert jnp.allclose(out, ref_f32, atol=2e-1), "mismatch vs f32 reference"

    # --- large batch exercising the Pallas grid (multi-tile + ragged tail) --
    key, kx2 = jax.random.split(key)
    big_b = 1000
    x_big = jax.random.normal(kx2, (big_b, n_inputs), jnp.float32)
    out_big = jax.block_until_ready(
        mlp_forward(x_big, params, t=0, flag=False, block_batch=256))
    assert out_big.shape == (big_b, n_outputs)
    ref_big = mlp_reference(x_big, params, use_bf16=True)
    assert jnp.allclose(out_big, ref_big, atol=1e-3, rtol=1e-3), "grid path mismatch"

    # --- forced-Pallas small batch: 2 grid steps, ragged masked last tile ---
    key, kx3 = jax.random.split(key)
    x_small = jax.random.normal(kx3, (100, n_inputs), jnp.float32)
    out_small = jax.block_until_ready(
        mlp_forward(x_small, params, t=0, flag=False,
                    block_batch=64, force_pallas=True))
    assert out_small.shape == (100, n_outputs)
    ref_small = mlp_reference(x_small, params, use_bf16=True)
    assert jnp.allclose(out_small, ref_small, atol=1e-3, rtol=1e-3), "ragged tile mismatch"

    print("KERNEL_OK")
</pallas_src>

<mosaic_0001>
module attributes {stable_mosaic.version = 11 : i64} {
  func.func @_mlp_kernel(%arg0: i32, %arg1: memref<256x32xf32, #tpu.memory_space<vmem>>, %arg2: memref<32x32xbf16, #tpu.memory_space<vmem>>, %arg3: memref<1x32xf32, #tpu.memory_space<vmem>>, %arg4: memref<32x32xbf16, #tpu.memory_space<vmem>>, %arg5: memref<1x32xf32, #tpu.memory_space<vmem>>, %arg6: memref<32x10xbf16, #tpu.memory_space<vmem>>, %arg7: memref<1x10xf32, #tpu.memory_space<vmem>>, %arg8: memref<256x10xf32, #tpu.memory_space<vmem>>) attributes {dimension_semantics = [#tpu.dimension_semantics<parallel>], iteration_bounds = array<i64: 4>, scalar_prefetch = 0 : i64, scratch_operands = 0 : i64, tpu.core_type = #tpu.core_type<tc>, window_params = [{transform_indices = @transform_0, window_bounds = array<i64: 256, 32>}, {pipeline_mode = #tpu.pipeline_mode<synchronous>, transform_indices = @transform_1, window_bounds = array<i64: 32, 32>}, {pipeline_mode = #tpu.pipeline_mode<synchronous>, transform_indices = @transform_2, window_bounds = array<i64: 1, 32>}, {pipeline_mode = #tpu.pipeline_mode<synchronous>, transform_indices = @transform_3, window_bounds = array<i64: 32, 32>}, {pipeline_mode = #tpu.pipeline_mode<synchronous>, transform_indices = @transform_4, window_bounds = array<i64: 1, 32>}, {pipeline_mode = #tpu.pipeline_mode<synchronous>, transform_indices = @transform_5, window_bounds = array<i64: 32, 10>}, {pipeline_mode = #tpu.pipeline_mode<synchronous>, transform_indices = @transform_6, window_bounds = array<i64: 1, 10>}, {transform_indices = @transform_7, window_bounds = array<i64: 256, 10>}]} {
    %c0 = arith.constant 0 : index
    %c0_0 = arith.constant 0 : index
    %0 = vector.load %arg1[%c0, %c0_0] : memref<256x32xf32, #tpu.memory_space<vmem>>, vector<256x32xf32>
    %1 = arith.truncf %0 : vector<256x32xf32> to vector<256x32xbf16>
    %c0_1 = arith.constant 0 : index
    %c0_2 = arith.constant 0 : index
    %2 = vector.load %arg2[%c0_1, %c0_2] : memref<32x32xbf16, #tpu.memory_space<vmem>>, vector<32x32xbf16>
    %cst = arith.constant dense<0.000000e+00> : vector<256x32xf32>
    %3 = tpu.matmul %1, %2, %cst {dimension_numbers = #tpu.dot_dimension_numbers<[1], [0], [0], [1], [0, 0, 1, 1], [], []>} : vector<256x32xbf16>, vector<32x32xbf16>, vector<256x32xf32> -> vector<256x32xf32>
    %c0_3 = arith.constant 0 : index
    %c0_4 = arith.constant 0 : index
    %4 = vector.load %arg3[%c0_3, %c0_4] : memref<1x32xf32, #tpu.memory_space<vmem>>, vector<1x32xf32>
    %5 = vector.broadcast %4 : vector<1x32xf32> to vector<256x32xf32>
    %6 = arith.addf %3, %5 : vector<256x32xf32>
    %cst_5 = arith.constant 0.000000e+00 : f32
    %7 = vector.broadcast %cst_5 : f32 to vector<256x32xf32>
    %8 = arith.maximumf %6, %7 : vector<256x32xf32>
    %9 = arith.truncf %8 : vector<256x32xf32> to vector<256x32xbf16>
    %c0_6 = arith.constant 0 : index
    %c0_7 = arith.constant 0 : index
    %10 = vector.load %arg4[%c0_6, %c0_7] : memref<32x32xbf16, #tpu.memory_space<vmem>>, vector<32x32xbf16>
    %cst_8 = arith.constant dense<0.000000e+00> : vector<256x32xf32>
    %11 = tpu.matmul %9, %10, %cst_8 {dimension_numbers = #tpu.dot_dimension_numbers<[1], [0], [0], [1], [0, 0, 1, 1], [], []>} : vector<256x32xbf16>, vector<32x32xbf16>, vector<256x32xf32> -> vector<256x32xf32>
    %c0_9 = arith.constant 0 : index
    %c0_10 = arith.constant 0 : index
    %12 = vector.load %arg5[%c0_9, %c0_10] : memref<1x32xf32, #tpu.memory_space<vmem>>, vector<1x32xf32>
    %13 = vector.broadcast %12 : vector<1x32xf32> to vector<256x32xf32>
    %14 = arith.addf %11, %13 : vector<256x32xf32>
    %cst_11 = arith.constant 0.000000e+00 : f32
    %15 = vector.broadcast %cst_11 : f32 to vector<256x32xf32>
    %16 = arith.maximumf %14, %15 : vector<256x32xf32>
    %17 = arith.truncf %16 : vector<256x32xf32> to vector<256x32xbf16>
    %c0_12 = arith.constant 0 : index
    %c0_13 = arith.constant 0 : index
    %18 = vector.load %arg6[%c0_12, %c0_13] : memref<32x10xbf16, #tpu.memory_space<vmem>>, vector<32x10xbf16>
    %cst_14 = arith.constant dense<0.000000e+00> : vector<256x10xf32>
    %19 = tpu.matmul %17, %18, %cst_14 {dimension_numbers = #tpu.dot_dimension_numbers<[1], [0], [0], [1], [0, 0, 1, 1], [], []>} : vector<256x32xbf16>, vector<32x10xbf16>, vector<256x10xf32> -> vector<256x10xf32>
    %c0_15 = arith.constant 0 : index
    %c0_16 = arith.constant 0 : index
    %20 = vector.load %arg7[%c0_15, %c0_16] : memref<1x10xf32, #tpu.memory_space<vmem>>, vector<1x10xf32>
    %21 = vector.broadcast %20 : vector<1x10xf32> to vector<256x10xf32>
    %22 = arith.addf %19, %21 : vector<256x10xf32>
    %c0_17 = arith.constant 0 : index
    %c0_18 = arith.constant 0 : index
    %23 = vector.load %arg8[%c0_17, %c0_18] : memref<256x10xf32, #tpu.memory_space<vmem>>, vector<256x10xf32>
    tpu.vector_store %arg8[%c0_17, %c0_18], %22 {strides = array<i32>} : memref<256x10xf32, #tpu.memory_space<vmem>>, vector<256x10xf32>,
    return
  }
  func.func @transform_0(%arg0: i32) -> (i32, i32) {
    %c0_i32 = arith.constant 0 : i32
    %c0_i32_0 = arith.constant 0 : i32
    return %arg0, %c0_i32 : i32, i32
  }
  func.func @transform_1(%arg0: i32) -> (i32, i32) {
    %c0_i32 = arith.constant 0 : i32
    %c0_i32_0 = arith.constant 0 : i32
    %c0_i32_1 = arith.constant 0 : i32
    return %c0_i32, %c0_i32_0 : i32, i32
  }
  func.func @transform_2(%arg0: i32) -> (i32, i32) {
    %c0_i32 = arith.constant 0 : i32
    %c0_i32_0 = arith.constant 0 : i32
    %c0_i32_1 = arith.constant 0 : i32
    return %c0_i32, %c0_i32_0 : i32, i32
  }
  func.func @transform_3(%arg0: i32) -> (i32, i32) {
    %c0_i32 = arith.constant 0 : i32
    %c0_i32_0 = arith.constant 0 : i32
    %c0_i32_1 = arith.constant 0 : i32
    return %c0_i32, %c0_i32_0 : i32, i32
  }
  func.func @transform_4(%arg0: i32) -> (i32, i32) {
    %c0_i32 = arith.constant 0 : i32
    %c0_i32_0 = arith.constant 0 : i32
    %c0_i32_1 = arith.constant 0 : i32
    return %c0_i32, %c0_i32_0 : i32, i32
  }
  func.func @transform_5(%arg0: i32) -> (i32, i32) {
    %c0_i32 = arith.constant 0 : i32
    %c0_i32_0 = arith.constant 0 : i32
    %c0_i32_1 = arith.constant 0 : i32
    return %c0_i32, %c0_i32_0 : i32, i32
  }
  func.func @transform_6(%arg0: i32) -> (i32, i32) {
    %c0_i32 = arith.constant 0 : i32
    %c0_i32_0 = arith.constant 0 : i32
    %c0_i32_1 = arith.constant 0 : i32
    return %c0_i32, %c0_i32_0 : i32, i32
  }
  func.func @transform_7(%arg0: i32) -> (i32, i32) {
    %c0_i32 = arith.constant 0 : i32
    %c0_i32_0 = arith.constant 0 : i32
    return %arg0, %c0_i32 : i32, i32
  }
}

</mosaic_0001>

<bundles_post_ra>
// kernel: tpu_custom_call.1
= control target key start
LH: loop header
LB: loop body
LE: loop exit
PB: predicated region body
PF: predicated region fallthrough
CT: control target
= control target key end

     0   :  { %s1620_s24 = smov 0   ;;  %s1622_s25 = smov 0   ;;  %s2077_s0 = inlined_call_operand.vmem [shape: f32[1000,32], index: 0, kind: input, shape index: {}]   ;;  %s2078_s1 = inlined_call_operand.vmem [shape: bf16[32,32], index: 1, kind: input, shape index: {}]   ;;  %s2079_s2 = inlined_call_operand.vmem [shape: f32[1,32], index: 2, kind: input, shape index: {}]   ;;  %s2080_s3 = inlined_call_operand.vmem [shape: bf16[32,32], index: 3, kind: input, shape index: {}]   ;;  %s2081_s4 = inlined_call_operand.vmem [shape: f32[1,32], index: 4, kind: input, shape index: {}]   ;;  %s2082_s5 = inlined_call_operand.vmem [shape: bf16[32,10], index: 5, kind: input, shape index: {}]   ;;  %s2083_s6 = inlined_call_operand.vmem [shape: f32[1,10], index: 6, kind: input, shape index: {}]   ;;  %s2084_s7 = inlined_call_operand.vmem [shape: f32[1000,10], index: 7, kind: output, shape index: {}]  }
   0x1   :  { %s1624_s26 = smov 0  }
   0x2 LB: > { %s1633_s27 = sadd.s32 4294967295, %s1546_s26   ;;  %s1635_s28 = sadd.s32 1, %s1546_s26   ;;  %s1546_s26 = sphi %s1624_s26, %s2093_s26   ;;  %s1542_s25 = sphi %s1622_s25, %s2092_s25   ;;  %s1538_s24 = sphi %s1620_s24, %s2091_s24  }
   0x3   : > { %s173_s29 = ssub.s32 %s1546_s26, %s1635_s28  ;;  %s176_s30 = sadd.s32 1, %s1542_s25 }
   0x4   : > { %p174_p0 = scmp.eq.s32.totalorder %s173_s29, 0  ;;  %p186_p1 = scmp.ne.s32.totalorder %s1542_s25, %s1538_s24 }
   0x5   : > { %p187_p2 = scmp.eq.s32.totalorder %s1633_s27, 3  ;;  %p1293_p3 = scmp.ge.s32.totalorder %s1546_s26, 1 }
   0x6   : > { %s1643_s8 = scalar_select %p174_p0, %s1542_s25, %s176_s30  }
   0x7   : > { %p1645_p4 = por %p187_p2, %p186_p1  ;;  %p246_p5 = scmp.lt.s32.totalorder %s1546_s26, 5 }
   0x9   : > { %p247_p6 = pnand %p1293_p3, %p246_p5 }
   0xa   : > { %s1653_s12 = sshll.u32 (!%p247_p6), %s1633_s27, 5 }
   0xb   : > { %250 = sbr.rel (%p247_p6) target bundleno = 687 (0x2af), region = 48  ;;  %p286_p7 = scmp.lt.s32.totalorder (!%p247_p6), %s1653_s12, 124 }
  0x10   : > { %v1387_v0 = vld [vmem:[%s2078_s1 + $0x8] sm:$0xff]  ;;  %v1386_v1 = vld [vmem:[%s2078_s1] sm:$0xff]  ;;  %s287_s15 = scalar_select %p286_p7, %s1653_s12, 124  ;;  %vm369_vm0 = vcmask 261120   ;;  %vm917_vm1 = vcmask 80896  }
  0x11   : > { %424 = vmatpush.bf16.msra.mxu0 %v1387_v0  ;;  %1395 = vmatpush.bf16.msra.mxu3 %v1387_v0  ;;  %v1389_v32 = vld [vmem:[%s2080_s3 + $0x8] sm:$0xff]  ;;  %v1388_v33 = vld [vmem:[%s2080_s3] sm:$0xff]  ;;  %s1392_s21 = sshll.u32 (%p1645_p4), %s1633_s27, 8 }
  0x12   : > { %s1296_s16 = sshll.u32 %s287_s15, 3  ;;  %629 = vmatpush.bf16.msra.mxu1 %v1389_v32  ;;  %v1712_v44 = vld [vmem:[%s2079_s2] ss:$0 sm:$0xff]  ;;  %s1942_s26 = scalar_lea.vmem (%p1645_p4), %s2084_s7, %s1392_s21  }
  0x13   : > { %s1663_s19 = scalar_lea.vmem %s2077_s0, %s1296_s16  ;;  %s278_s16 = sand.u32 1, %s1538_s24  }
  0x14   : > { %v301_v2 = vld [vmem:[%s1663_s19] sm:$0xff]  ;;  %v302_v3 = vld [vmem:[%s1663_s19 + $0x8] sm:$0xff]  ;;  %v303_v5 = vld [vmem:[%s1663_s19 + $0x10] sm:$0xff]  ;;  %s1294_s17 = sshll.u32 %s278_s16, 8  ;;  %s958_s24 = ssub.s32 (%p1645_p4), 125, %s1653_s12 }
  0x15   : > { %425 = vmatpush.bf16.msra.mxu0 %v1386_v1  ;;  %1396 = vmatpush.bf16.msra.mxu3 %v1386_v1  ;;  %v333_v4 = vpack.c.bf16 %v302_v3, %v301_v2  ;;  %v304_v6 = vld [vmem:[%s1663_s19 + $0x18] sm:$0xff]  ;;  %v305_v8 = vld [vmem:[%s1663_s19 + $0x20] sm:$0xff]  ;;  %v306_v9 = vld [vmem:[%s1663_s19 + $0x28] sm:$0xff]  ;;  %s1829_s20 = scalar_lea.vmem [#allocation2], %s1294_s17   ;;  %p959_p8 = scmp.lt.s32.totalorder (%p1645_p4), %s958_s24, 32 }
  0x16   : > { %v334_v7 = vpack.c.bf16 %v304_v6, %v303_v5  ;;  %v335_v10 = vpack.c.bf16 %v306_v9, %v305_v8  ;;  %v307_v11 = vld [vmem:[%s1663_s19 + $0x30] sm:$0xff]  ;;  %v308_v12 = vld [vmem:[%s1663_s19 + $0x38] sm:$0xff]  ;;  %v325_v14 = vld [vmem:[%s1663_s19 + $0xc0] sm:$0xff]  ;;  %630 = vmatpush.bf16.msra.mxu1 %v1388_v33 }
  0x17   : > { %v336_v13 = vpack.c.bf16 %v308_v12, %v307_v11  ;;  %v326_v15 = vld [vmem:[%s1663_s19 + $0xc8] sm:$0xff]  ;;  %v309_v17 = vld [vmem:[%s1663_s19 + $0x40] sm:$0xff]  ;;  %v327_v20 = vld [vmem:[%s1663_s19 + $0xd0] sm:$0xff] }
  0x18   : > { %1305 = vmatmul.msk.bf16.vlgmr.msra.gmra.mxu0 %vm369_vm0, %v333_v4  ;;  %v345_v16 = vpack.c.bf16 %v326_v15, %v325_v14  ;;  %v310_v18 = vld [vmem:[%s1663_s19 + $0x48] sm:$0xff]  ;;  %v328_v21 = vld [vmem:[%s1663_s19 + $0xd8] sm:$0xff]  ;;  %v311_v23 = vld [vmem:[%s1663_s19 + $0x50] sm:$0xff] }
  0x19   : > { %v337_v19 = vpack.c.bf16 %v310_v18, %v309_v17  ;;  %v346_v22 = vpack.c.bf16 %v328_v21, %v327_v20  ;;  %v312_v24 = vld [vmem:[%s1663_s19 + $0x58] sm:$0xff]  ;;  %v329_v26 = vld [vmem:[%s1663_s19 + $0xe0] sm:$0xff]  ;;  %v330_v27 = vld [vmem:[%s1663_s19 + $0xe8] sm:$0xff]  ;;  %1397 = vmatpush.bf16.msrb.mxu3 %v1389_v32 }
  0x1a   : > { %1317 = vmatmul.msk.bf16.vlgmr.msra.gmra.mxu3 %vm369_vm0, %v345_v16  ;;  %v338_v25 = vpack.c.bf16 %v312_v24, %v311_v23  ;;  %v347_v28 = vpack.c.bf16 %v330_v27, %v329_v26  ;;  %v313_v29 = vld [vmem:[%s1663_s19 + $0x60] sm:$0xff]  ;;  %v314_v30 = vld [vmem:[%s1663_s19 + $0x68] sm:$0xff]  ;;  %v315_v34 = vld [vmem:[%s1663_s19 + $0x70] sm:$0xff] }
  0x1b   : > { %v339_v31 = vpack.c.bf16 %v314_v30, %v313_v29  ;;  %v316_v35 = vld [vmem:[%s1663_s19 + $0x78] sm:$0xff]  ;;  %v331_v36 = vld [vmem:[%s1663_s19 + $0xf0] sm:$0xff]  ;;  %v317_v40 = vld [vmem:[%s1663_s19 + $0x80] sm:$0xff] }
  0x1c   : > { %v332_v37 = vld [vmem:[%s1663_s19 + $0xf8] sm:$0xff]  ;;  %v340_v39 = vpack.c.bf16 %v316_v35, %v315_v34  ;;  %v318_v41 = vld [vmem:[%s1663_s19 + $0x88] sm:$0xff]  ;;  %v319_v50 = vld [vmem:[%s1663_s19 + $0x90] sm:$0xff] }
  0x1d   : > { %1398 = vmatpush.bf16.msrb.mxu3 %v1388_v33  ;;  %v348_v38 = vpack.c.bf16 %v332_v37, %v331_v36  ;;  %v341_v42 = vpack.c.bf16 %v318_v41, %v317_v40  ;;  %v320_v51 = vld [vmem:[%s1663_s19 + $0x98] sm:$0xff]  ;;  %v321_v60 = vld [vmem:[%s1663_s19 + $0xa0] sm:$0xff]  ;;  %v322_v61 = vld [vmem:[%s1663_s19 + $0xa8] sm:$0xff] }
  0x1e   : > { %v342_v53 = vpack.c.bf16 %v320_v51, %v319_v50  ;;  %v343_v63 = vpack.c.bf16 %v322_v61, %v321_v60  ;;  %v323_v6 = vld [vmem:[%s1663_s19 + $0xb0] sm:$0xff] }
  0x28   : > { %1306 = vmatmul.msk.bf16.gmra.mxu0 %vm369_vm0, %v334_v7  ;;  %v324_v7 = vld [vmem:[%s1663_s19 + $0xb8] sm:$0xff] }
  0x29   : > { %v344_v9 = vpack.c.bf16 %v324_v7, %v323_v6 }
  0x2a   : > { %1318 = vmatmul.msk.bf16.gmra.mxu3 %vm369_vm0, %v346_v22 }
  0x38   : > { %1307 = vmatmul.msk.bf16.gmra.mxu0 %vm369_vm0, %v335_v10 }
  0x3a   : > { %1319 = vmatmul.msk.bf16.gmra.mxu3 %vm369_vm0, %v347_v28 }
  0x48   : > { %1308 = vmatmul.msk.bf16.gmra.mxu0 %vm369_vm0, %v336_v13 }
  0x4a   : > { %1320 = vmatmul.msk.bf16.gmra.mxu3 %vm369_vm0, %v348_v38 }
  0x58   : > { %1309 = vmatmul.msk.bf16.gmra.mxu0 %vm369_vm0, %v337_v19 }
  0x68   : > { %1310 = vmatmul.msk.bf16.gmra.mxu0 %vm369_vm0, %v338_v25 }
  0x78   : > { %1311 = vmatmul.msk.bf16.gmra.mxu0 %vm369_vm0, %v339_v31 }
  0x88   : > { %1312 = vmatmul.msk.bf16.gmra.mxu0 %vm369_vm0, %v340_v39 }
  0x95   : > { %v427_v43 = vpop.f32.mrf.mxu0 }
  0x96   : > { %v428_v45 = vadd.f32 %v1712_v44, %v427_v43 }
  0x98   : > { %1313 = vmatmul.msk.bf16.gmra.mxu0 %vm369_vm0, %v341_v42  ;;  %v507_v48 = vmax.f32 %v428_v45, 0.0 }
  0x9d   : > { %v429_v46 = vpop.f32.mrf.mxu0  ;;  %v487_v18 = vpop.f32.mrf.mxu3 }
  0x9e   : > { %v430_v47 = vadd.f32 %v1712_v44, %v429_v46  ;;  %v488_v20 = vadd.f32 %v1712_v44, %v487_v18 }
  0xa0   : > { %v508_v49 = vmax.f32 %v430_v47, 0.0  ;;  %v531_v26 = vmax.f32 %v488_v20, 0.0  ;;  %v1771_v20 = vld [vmem:[%s2081_s4] ss:$0 sm:$0xff] }
  0xa2   : > { %v539_v52 = vpack.c.bf16 %v508_v49, %v507_v48 }
  0xa4   : > { %1329 = vmatmul.msk.bf16.vlgmr.msra.gmra.mxu1 %vm369_vm0, %v539_v52 }
  0xa5   : > { %v432_v54 = vpop.f32.mrf.mxu0  ;;  %v489_v23 = vpop.f32.mrf.mxu3 }
  0xa6   : > { %v433_v55 = vadd.f32 %v1712_v44, %v432_v54  ;;  %v490_v27 = vadd.f32 %v1712_v44, %v489_v23 }
  0xa8   : > { %1314 = vmatmul.msk.bf16.gmra.mxu0 %vm369_vm0, %v342_v53  ;;  %v509_v58 = vmax.f32 %v433_v55, 0.0  ;;  %v532_v29 = vmax.f32 %v490_v27, 0.0 }
  0xaa   : > { %v551_v30 = vpack.c.bf16 %v532_v29, %v531_v26 }
  0xac   : > { %1341 = vmatmul.msk.bf16.vlgmr.msrb.gmra.mxu3 %vm369_vm0, %v551_v30 }
  0xad   : > { %v434_v56 = vpop.f32.mrf.mxu0  ;;  %v492_v32 = vpop.f32.mrf.mxu3 }
  0xae   : > { %v435_v57 = vadd.f32 %v1712_v44, %v434_v56  ;;  %v493_v34 = vadd.f32 %v1712_v44, %v492_v32 }
  0xb0   : > { %v510_v59 = vmax.f32 %v435_v57, 0.0  ;;  %v533_v40 = vmax.f32 %v493_v34, 0.0 }
  0xb2   : > { %v540_v62 = vpack.c.bf16 %v510_v59, %v509_v58 }
  0xb4   : > { %1330 = vmatmul.msk.bf16.gmra.mxu1 %vm369_vm0, %v540_v62  ;;  %v1391_v62 = vld [vmem:[%s2082_s5 + $0x8] sm:$0xff] }
  0xb5   : > { %v437_v0 = vpop.f32.mrf.mxu0  ;;  %v494_v37 = vpop.f32.mrf.mxu3  ;;  %834 = vmatpush.bf16.msra.mxu2 %v1391_v62  ;;  %1399 = vmatpush.bf16.msra.mxu3 %v1391_v62 }
  0xb6   : > { %v438_v1 = vadd.f32 %v1712_v44, %v437_v0  ;;  %v495_v41 = vadd.f32 %v1712_v44, %v494_v37 }
  0xb8   : > { %1315 = vmatmul.msk.bf16.gmra.mxu0 %vm369_vm0, %v343_v63  ;;  %v511_v4 = vmax.f32 %v438_v1, 0.0  ;;  %v534_v43 = vmax.f32 %v495_v41, 0.0  ;;  %v1390_v63 = vld [vmem:[%s2082_s5] sm:$0xff] }
  0xb9   : > { %835 = vmatpush.bf16.msra.mxu2 %v1390_v63  ;;  %1400 = vmatpush.bf16.msra.mxu3 %v1390_v63 }
  0xba   : > { %v552_v45 = vpack.c.bf16 %v534_v43, %v533_v40 }
  0xbc   : > { %1342 = vmatmul.msk.bf16.gmra.mxu3 %vm369_vm0, %v552_v45 }
  0xbd   : > { %v439_v2 = vpop.f32.mrf.mxu0  ;;  %v497_v47 = vpop.f32.mrf.mxu3 }
  0xbe   : > { %v440_v3 = vadd.f32 %v1712_v44, %v439_v2  ;;  %v498_v49 = vadd.f32 %v1712_v44, %v497_v47 }
  0xc0   : > { %v512_v5 = vmax.f32 %v440_v3, 0.0  ;;  %v535_v55 = vmax.f32 %v498_v49, 0.0 }
  0xc2   : > { %v541_v8 = vpack.c.bf16 %v512_v5, %v511_v4 }
  0xc4   : > { %1331 = vmatmul.msk.bf16.gmra.mxu1 %vm369_vm0, %v541_v8 }
  0xc5   : > { %v442_v10 = vpop.f32.mrf.mxu0  ;;  %v499_v52 = vpop.f32.mrf.mxu3 }
  0xc6   : > { %v443_v11 = vadd.f32 %v1712_v44, %v442_v10  ;;  %v500_v56 = vadd.f32 %v1712_v44, %v499_v52 }
  0xc8   : > { %1316 = vmatmul.msk.bf16.gmra.mxu0 %vm369_vm0, %v344_v9  ;;  %v513_v14 = vmax.f32 %v443_v11, 0.0  ;;  %v536_v58 = vmax.f32 %v500_v56, 0.0 }
  0xca   : > { %v553_v59 = vpack.c.bf16 %v536_v58, %v535_v55 }
  0xcc   : > { %1343 = vmatmul.msk.bf16.gmra.mxu3 %vm369_vm0, %v553_v59 }
  0xcd   : > { %v444_v12 = vpop.f32.mrf.mxu0  ;;  %v502_v61 = vpop.f32.mrf.mxu3 }
  0xce   : > { %v445_v13 = vadd.f32 %v1712_v44, %v444_v12  ;;  %v503_v1 = vadd.f32 %v1712_v44, %v502_v61 }
  0xd0   : > { %v514_v15 = vmax.f32 %v445_v13, 0.0  ;;  %v537_v7 = vmax.f32 %v503_v1, 0.0 }
  0xd2   : > { %v542_v16 = vpack.c.bf16 %v514_v15, %v513_v14 }
  0xd4   : > { %1332 = vmatmul.msk.bf16.gmra.mxu1 %vm369_vm0, %v542_v16 }
  0xd5   : > { %v447_v17 = vpop.f32.mrf.mxu0  ;;  %v504_v4 = vpop.f32.mrf.mxu3 }
  0xd6   : > { %v448_v19 = vadd.f32 %v1712_v44, %v447_v17  ;;  %v505_v8 = vadd.f32 %v1712_v44, %v504_v4 }
  0xd8   : > { %v515_v24 = vmax.f32 %v448_v19, 0.0  ;;  %v538_v10 = vmax.f32 %v505_v8, 0.0 }
  0xda   : > { %v554_v11 = vpack.c.bf16 %v538_v10, %v537_v7 }
  0xdc   : > { %1344 = vmatmul.msk.bf16.gmra.mxu3 %vm369_vm0, %v554_v11 }
  0xdd   : > { %v449_v21 = vpop.f32.mrf.mxu0 }
  0xde   : > { %v450_v22 = vadd.f32 %v1712_v44, %v449_v21 }
  0xe0   : > { %v516_v25 = vmax.f32 %v450_v22, 0.0 }
  0xe2   : > { %v543_v28 = vpack.c.bf16 %v516_v25, %v515_v24 }
  0xe4   : > { %1333 = vmatmul.msk.bf16.gmra.mxu1 %vm369_vm0, %v543_v28 }
  0xe5   : > { %v452_v31 = vpop.f32.mrf.mxu0 }
  0xe6   : > { %v453_v33 = vadd.f32 %v1712_v44, %v452_v31 }
  0xe8   : > { %v517_v38 = vmax.f32 %v453_v33, 0.0 }
  0xed   : > { %v454_v35 = vpop.f32.mrf.mxu0 }
  0xee   : > { %v455_v36 = vadd.f32 %v1712_v44, %v454_v35 }
  0xf0   : > { %v518_v39 = vmax.f32 %v455_v36, 0.0 }
  0xf2   : > { %v544_v42 = vpack.c.bf16 %v518_v39, %v517_v38 }
  0xf4   : > { %1334 = vmatmul.msk.bf16.gmra.mxu1 %vm369_vm0, %v544_v42 }
  0xf5   : > { %v457_v46 = vpop.f32.mrf.mxu0 }
  0xf6   : > { %v458_v48 = vadd.f32 %v1712_v44, %v457_v46 }
  0xf8   : > { %v519_v53 = vmax.f32 %v458_v48, 0.0 }
  0xfd   : > { %v459_v50 = vpop.f32.mrf.mxu0 }
  0xfe   : > { %v460_v51 = vadd.f32 %v1712_v44, %v459_v50 }
 0x100   : > { %v520_v54 = vmax.f32 %v460_v51, 0.0 }
 0x102   : > { %v545_v57 = vpack.c.bf16 %v520_v54, %v519_v53 }
 0x104   : > { %1335 = vmatmul.msk.bf16.gmra.mxu1 %vm369_vm0, %v545_v57 }
 0x105   : > { %v462_v60 = vpop.f32.mrf.mxu0 }
 0x106   : > { %v463_v0 = vadd.f32 %v1712_v44, %v462_v60 }
 0x108   : > { %v521_v5 = vmax.f32 %v463_v0, 0.0 }
 0x10d   : > { %v464_v2 = vpop.f32.mrf.mxu0 }
 0x10e   : > { %v465_v3 = vadd.f32 %v1712_v44, %v464_v2 }
 0x110   : > { %v522_v6 = vmax.f32 %v465_v3, 0.0 }
 0x112   : > { %v546_v9 = vpack.c.bf16 %v522_v6, %v521_v5 }
 0x114   : > { %1336 = vmatmul.msk.bf16.gmra.mxu1 %vm369_vm0, %v546_v9 }
 0x115   : > { %v467_v12 = vpop.f32.mrf.mxu0 }
 0x116   : > { %v468_v13 = vadd.f32 %v1712_v44, %v467_v12 }
 0x118   : > { %v523_v16 = vmax.f32 %v468_v13, 0.0 }
 0x11d   : > { %v469_v14 = vpop.f32.mrf.mxu0 }
 0x11e   : > { %v470_v15 = vadd.f32 %v1712_v44, %v469_v14 }
 0x120   : > { %v524_v17 = vmax.f32 %v470_v15, 0.0 }
 0x121   : > { %v632_v18 = vpop.f32.mrf.mxu1 }
 0x122   : > { %v547_v19 = vpack.c.bf16 %v524_v17, %v523_v16  ;;  %v633_v22 = vadd.f32 %v1771_v20, %v632_v18 }
 0x124   : > { %1337 = vmatmul.msk.bf16.gmra.mxu1 %vm369_vm0, %v547_v19  ;;  %v712_v25 = vmax.f32 %v633_v22, 0.0 }
 0x125   : > { %v472_v21 = vpop.f32.mrf.mxu0 }
 0x126   : > { %v473_v26 = vadd.f32 %v1712_v44, %v472_v21 }
 0x128   : > { %v525_v31 = vmax.f32 %v473_v26, 0.0 }
 0x129   : > { %v634_v23 = vpop.f32.mrf.mxu1 }
 0x12a   : > { %v635_v24 = vadd.f32 %v1771_v20, %v634_v23 }
 0x12c   : > { %v713_v27 = vmax.f32 %v635_v24, 0.0 }
 0x12d   : > { %v474_v28 = vpop.f32.mrf.mxu0 }
 0x12e   : > { %v744_v29 = vpack.c.bf16 %v713_v27, %v712_v25  ;;  %v475_v30 = vadd.f32 %v1712_v44, %v474_v28 }
 0x12f   : > { %v692_v8 = vpop.f32.mrf.mxu3 }
 0x130   : > { %v526_v32 = vmax.f32 %v475_v30, 0.0  ;;  %1353 = vmatmul.msk.bf16.vlgmr.msra.gmra.mxu2 %vm369_vm0, %v744_v29  ;;  %v693_v13 = vadd.f32 %v1771_v20, %v692_v8 }
 0x131   : > { %v637_v33 = vpop.f32.mrf.mxu1 }
 0x132   : > { %v548_v34 = vpack.c.bf16 %v526_v32, %v525_v31  ;;  %v638_v36 = vadd.f32 %v1771_v20, %v637_v33  ;;  %v736_v16 = vmax.f32 %v693_v13, 0.0 }
 0x134   : > { %1338 = vmatmul.msk.bf16.gmra.mxu1 %vm369_vm0, %v548_v34  ;;  %v714_v39 = vmax.f32 %v638_v36, 0.0 }
 0x135   : > { %v477_v35 = vpop.f32.mrf.mxu0 }
 0x136   : > { %v478_v40 = vadd.f32 %v1712_v44, %v477_v35 }
 0x137   : > { %v694_v15 = vpop.f32.mrf.mxu3 }
 0x138   : > { %v527_v46 = vmax.f32 %v478_v40, 0.0  ;;  %v695_v17 = vadd.f32 %v1771_v20, %v694_v15 }
 0x139   : > { %v639_v37 = vpop.f32.mrf.mxu1 }
 0x13a   : > { %v640_v38 = vadd.f32 %v1771_v20, %v639_v37  ;;  %v737_v18 = vmax.f32 %v695_v17, 0.0 }
 0x13c   : > { %v715_v41 = vmax.f32 %v640_v38, 0.0  ;;  %v756_v19 = vpack.c.bf16 %v737_v18, %v736_v16 }
 0x13d   : > { %v479_v42 = vpop.f32.mrf.mxu0 }
 0x13e   : > { %v745_v43 = vpack.c.bf16 %v715_v41, %v714_v39  ;;  %v480_v45 = vadd.f32 %v1712_v44, %v479_v42  ;;  %1365 = vmatmul.msk.bf16.vlgmr.msra.gmra.mxu3 %vm369_vm0, %v756_v19 }
 0x13f   : > { %v697_v23 = vpop.f32.mrf.mxu3 }
 0x140   : > { %v528_v47 = vmax.f32 %v480_v45, 0.0  ;;  %1354 = vmatmul.msk.bf16.gmra.mxu2 %vm369_vm0, %v745_v43  ;;  %v698_v28 = vadd.f32 %v1771_v20, %v697_v23 }
 0x141   : > { %v642_v48 = vpop.f32.mrf.mxu1 }
 0x142   : > { %v549_v49 = vpack.c.bf16 %v528_v47, %v527_v46  ;;  %v643_v51 = vadd.f32 %v1771_v20, %v642_v48  ;;  %v738_v31 = vmax.f32 %v698_v28, 0.0 }
 0x144   : > { %1339 = vmatmul.msk.bf16.gmra.mxu1 %vm369_vm0, %v549_v49  ;;  %v716_v54 = vmax.f32 %v643_v51, 0.0 }
 0x145   : > { %v482_v50 = vpop.f32.mrf.mxu0 }
 0x146   : > { %v483_v55 = vadd.f32 %v1712_v44, %v482_v50 }
 0x147   : > { %v699_v30 = vpop.f32.mrf.mxu3 }
 0x148   : > { %v529_v60 = vmax.f32 %v483_v55, 0.0  ;;  %v700_v32 = vadd.f32 %v1771_v20, %v699_v30 }
 0x149   : > { %v644_v52 = vpop.f32.mrf.mxu1 }
 0x14a   : > { %v645_v53 = vadd.f32 %v1771_v20, %v644_v52  ;;  %v739_v33 = vmax.f32 %v700_v32, 0.0 }
 0x14c   : > { %v717_v56 = vmax.f32 %v645_v53, 0.0  ;;  %v757_v34 = vpack.c.bf16 %v739_v33, %v738_v31 }
 0x14d   : > { %v484_v57 = vpop.f32.mrf.mxu0 }
 0x14e   : > { %v746_v58 = vpack.c.bf16 %v717_v56, %v716_v54  ;;  %v485_v59 = vadd.f32 %v1712_v44, %v484_v57  ;;  %1366 = vmatmul.msk.bf16.gmra.mxu3 %vm369_vm0, %v757_v34 }
 0x14f   : > { %v702_v37 = vpop.f32.mrf.mxu3 }
 0x150   : > { %v530_v61 = vmax.f32 %v485_v59, 0.0  ;;  %1355 = vmatmul.msk.bf16.gmra.mxu2 %vm369_vm0, %v746_v58  ;;  %v703_v42 = vadd.f32 %v1771_v20, %v702_v37 }
 0x151   : > { %v647_v62 = vpop.f32.mrf.mxu1 }
 0x152   : > { %v550_v63 = vpack.c.bf16 %v530_v61, %v529_v60  ;;  %v648_v0 = vadd.f32 %v1771_v20, %v647_v62  ;;  %v740_v46 = vmax.f32 %v703_v42, 0.0 }
 0x154   : > { %1340 = vmatmul.msk.bf16.gmra.mxu1 %vm369_vm0, %v550_v63  ;;  %v718_v3 = vmax.f32 %v648_v0, 0.0 }
 0x157   : > { %v704_v45 = vpop.f32.mrf.mxu3 }
 0x158   : > { %v705_v47 = vadd.f32 %v1771_v20, %v704_v45 }
 0x159   : > { %v649_v1 = vpop.f32.mrf.mxu1 }
 0x15a   : > { %v650_v2 = vadd.f32 %v1771_v20, %v649_v1  ;;  %v741_v48 = vmax.f32 %v705_v47, 0.0 }
 0x15c   : > { %v719_v4 = vmax.f32 %v650_v2, 0.0  ;;  %v758_v49 = vpack.c.bf16 %v741_v48, %v740_v46 }
 0x15e   : > { %v747_v5 = vpack.c.bf16 %v719_v4, %v718_v3  ;;  %1367 = vmatmul.msk.bf16.gmra.mxu3 %vm369_vm0, %v758_v49 }
 0x15f   : > { %v707_v52 = vpop.f32.mrf.mxu3 }
 0x160   : > { %1356 = vmatmul.msk.bf16.gmra.mxu2 %vm369_vm0, %v747_v5  ;;  %v708_v57 = vadd.f32 %v1771_v20, %v707_v52 }
 0x161   : > { %v652_v6 = vpop.f32.mrf.mxu1 }
 0x162   : > { %v653_v44 = vadd.f32 %v1771_v20, %v652_v6  ;;  %v742_v60 = vmax.f32 %v708_v57, 0.0  ;;  %v1826_v6 = vld [vmem:[%s2083_s6] ss:$0 sm:$0xff] }
 0x164   : > { %v720_v10 = vmax.f32 %v653_v44, 0.0 }
 0x167   : > { %v709_v59 = vpop.f32.mrf.mxu3 }
 0x168   : > { %v710_v61 = vadd.f32 %v1771_v20, %v709_v59 }
 0x169   : > { %v654_v7 = vpop.f32.mrf.mxu1 }
 0x16a   : > { %v655_v9 = vadd.f32 %v1771_v20, %v654_v7  ;;  %v743_v62 = vmax.f32 %v710_v61, 0.0 }
 0x16c   : > { %v721_v11 = vmax.f32 %v655_v9, 0.0  ;;  %v759_v63 = vpack.c.bf16 %v743_v62, %v742_v60 }
 0x16e   : > { %v748_v12 = vpack.c.bf16 %v721_v11, %v720_v10  ;;  %1368 = vmatmul.msk.bf16.gmra.mxu3 %vm369_vm0, %v759_v63 }
 0x170   : > { %1357 = vmatmul.msk.bf16.gmra.mxu2 %vm369_vm0, %v748_v12 }
 0x171   : > { %v657_v14 = vpop.f32.mrf.mxu1 }
 0x172   : > { %v658_v21 = vadd.f32 %v1771_v20, %v657_v14 }
 0x174   : > { %v722_v25 = vmax.f32 %v658_v21, 0.0 }
 0x179   : > { %v659_v22 = vpop.f32.mrf.mxu1 }
 0x17a   : > { %v660_v24 = vadd.f32 %v1771_v20, %v659_v22 }
 0x17c   : > { %v723_v26 = vmax.f32 %v660_v24, 0.0 }
 0x17e   : > { %v749_v27 = vpack.c.bf16 %v723_v26, %v722_v25 }
 0x180   : > { %1358 = vmatmul.msk.bf16.gmra.mxu2 %vm369_vm0, %v749_v27 }
 0x181   : > { %v662_v29 = vpop.f32.mrf.mxu1 }
 0x182   : > { %v663_v35 = vadd.f32 %v1771_v20, %v662_v29 }
 0x184   : > { %v724_v39 = vmax.f32 %v663_v35, 0.0 }
 0x189   : > { %v664_v36 = vpop.f32.mrf.mxu1 }
 0x18a   : > { %v665_v38 = vadd.f32 %v1771_v20, %v664_v36 }
 0x18c   : > { %v725_v40 = vmax.f32 %v665_v38, 0.0 }
 0x18e   : > { %v750_v41 = vpack.c.bf16 %v725_v40, %v724_v39 }
 0x190   : > { %1359 = vmatmul.msk.bf16.gmra.mxu2 %vm369_vm0, %v750_v41 }
 0x191   : > { %v667_v43 = vpop.f32.mrf.mxu1 }
 0x192   : > { %v668_v50 = vadd.f32 %v1771_v20, %v667_v43 }
 0x194   : > { %v726_v54 = vmax.f32 %v668_v50, 0.0 }
 0x199   : > { %v669_v51 = vpop.f32.mrf.mxu1 }
 0x19a   : > { %v670_v53 = vadd.f32 %v1771_v20, %v669_v51 }
 0x19c   : > { %v727_v55 = vmax.f32 %v670_v53, 0.0 }
 0x19e   : > { %v751_v56 = vpack.c.bf16 %v727_v55, %v726_v54 }
 0x1a0   : > { %1360 = vmatmul.msk.bf16.gmra.mxu2 %vm369_vm0, %v751_v56 }
 0x1a1   : > { %v672_v58 = vpop.f32.mrf.mxu1 }
 0x1a2   : > { %v673_v0 = vadd.f32 %v1771_v20, %v672_v58 }
 0x1a4   : > { %v728_v3 = vmax.f32 %v673_v0, 0.0 }
 0x1a9   : > { %v674_v1 = vpop.f32.mrf.mxu1 }
 0x1aa   : > { %v675_v2 = vadd.f32 %v1771_v20, %v674_v1 }
 0x1ac   : > { %v729_v4 = vmax.f32 %v675_v2, 0.0 }
 0x1ae   : > { %v752_v5 = vpack.c.bf16 %v729_v4, %v728_v3 }
 0x1b0   : > { %1361 = vmatmul.msk.bf16.gmra.mxu2 %vm369_vm0, %v752_v5 }
 0x1b1   : > { %v677_v44 = vpop.f32.mrf.mxu1 }
 0x1b2   : > { %v678_v9 = vadd.f32 %v1771_v20, %v677_v44 }
 0x1b3   : > { %v837_v7 = vpop.f32.mrf.mxu2 }
 0x1b4   : > { %v838_v8 = vadd.f32 %v1826_v6, %v837_v7  ;;  %v730_v13 = vmax.f32 %v678_v9, 0.0 }
 0x1b6   : > { %918 = vst.msk [vmem:[%s1829_s20] sm:$0xff] %vm917_vm1, %v838_v8 }
 0x1b9   : > { %v679_v10 = vpop.f32.mrf.mxu1 }
 0x1ba   : > { %v680_v11 = vadd.f32 %v1771_v20, %v679_v10 }
 0x1bb   : > { %v839_v12 = vpop.f32.mrf.mxu2 }
 0x1bc   : > { %v731_v14 = vmax.f32 %v680_v11, 0.0  ;;  %v840_v15 = vadd.f32 %v1826_v6, %v839_v12 }
 0x1be   : > { %v753_v16 = vpack.c.bf16 %v731_v14, %v730_v13  ;;  %919 = vst.msk [vmem:[%s1829_s20 + $0x8] sm:$0xff] %vm917_vm1, %v840_v15 }
 0x1c0   : > { %1362 = vmatmul.msk.bf16.gmra.mxu2 %vm369_vm0, %v753_v16 }
 0x1c1   : > { %v682_v17 = vpop.f32.mrf.mxu1  ;;  %v897_v47 = vpop.f32.mrf.mxu3 }
 0x1c2   : > { %v683_v21 = vadd.f32 %v1771_v20, %v682_v17  ;;  %v898_v49 = vadd.f32 %v1826_v6, %v897_v47 }
 0x1c3   : > { %v842_v18 = vpop.f32.mrf.mxu2 }
 0x1c4   : > { %v843_v19 = vadd.f32 %v1826_v6, %v842_v18  ;;  %v732_v25 = vmax.f32 %v683_v21, 0.0  ;;  %942 = vst.msk [vmem:[%s1829_s20 + $0xc0] sm:$0xff] %vm917_vm1, %v898_v49 }
 0x1c6   : > { %920 = vst.msk [vmem:[%s1829_s20 + $0x10] sm:$0xff] %vm917_vm1, %v843_v19 }
 0x1c9   : > { %v684_v22 = vpop.f32.mrf.mxu1  ;;  %v899_v51 = vpop.f32.mrf.mxu3 }
 0x1ca   : > { %v685_v23 = vadd.f32 %v1771_v20, %v684_v22  ;;  %v900_v53 = vadd.f32 %v1826_v6, %v899_v51 }
 0x1cb   : > { %v844_v24 = vpop.f32.mrf.mxu2 }
 0x1cc   : > { %v733_v26 = vmax.f32 %v685_v23, 0.0  ;;  %v845_v27 = vadd.f32 %v1826_v6, %v844_v24  ;;  %943 = vst.msk [vmem:[%s1829_s20 + $0xc8] sm:$0xff] %vm917_vm1, %v900_v53 }
 0x1ce   : > { %v754_v28 = vpack.c.bf16 %v733_v26, %v732_v25  ;;  %921 = vst.msk [vmem:[%s1829_s20 + $0x18] sm:$0xff] %vm917_vm1, %v845_v27 }
 0x1d0   : > { %1363 = vmatmul.msk.bf16.gmra.mxu2 %vm369_vm0, %v754_v28 }
 0x1d1   : > { %v687_v29 = vpop.f32.mrf.mxu1  ;;  %v902_v55 = vpop.f32.mrf.mxu3 }
 0x1d2   : > { %v688_v32 = vadd.f32 %v1771_v20, %v687_v29  ;;  %v903_v57 = vadd.f32 %v1826_v6, %v902_v55 }
 0x1d3   : > { %v847_v30 = vpop.f32.mrf.mxu2 }
 0x1d4   : > { %v848_v31 = vadd.f32 %v1826_v6, %v847_v30  ;;  %v734_v36 = vmax.f32 %v688_v32, 0.0  ;;  %944 = vst.msk [vmem:[%s1829_s20 + $0xd0] sm:$0xff] %vm917_vm1, %v903_v57 }
 0x1d6   : > { %922 = vst.msk [vmem:[%s1829_s20 + $0x20] sm:$0xff] %vm917_vm1, %v848_v31 }
 0x1d9   : > { %v689_v33 = vpop.f32.mrf.mxu1  ;;  %v904_v59 = vpop.f32.mrf.mxu3 }
 0x1da   : > { %v690_v34 = vadd.f32 %v1771_v20, %v689_v33  ;;  %v905_v61 = vadd.f32 %v1826_v6, %v904_v59 }
 0x1db   : > { %v849_v35 = vpop.f32.mrf.mxu2 }
 0x1dc   : > { %v735_v37 = vmax.f32 %v690_v34, 0.0  ;;  %v850_v38 = vadd.f32 %v1826_v6, %v849_v35  ;;  %945 = vst.msk [vmem:[%s1829_s20 + $0xd8] sm:$0xff] %vm917_vm1, %v905_v61 }
 0x1de   : > { %v755_v39 = vpack.c.bf16 %v735_v37, %v734_v36  ;;  %923 = vst.msk [vmem:[%s1829_s20 + $0x28] sm:$0xff] %vm917_vm1, %v850_v38 }
 0x1e0   : > { %1364 = vmatmul.msk.bf16.gmra.mxu2 %vm369_vm0, %v755_v39 }
 0x1e1   : > { %v907_v63 = vpop.f32.mrf.mxu3 }
 0x1e2   : > { %v908_v1 = vadd.f32 %v1826_v6, %v907_v63 }
 0x1e3   : > { %v852_v40 = vpop.f32.mrf.mxu2 }
 0x1e4   : > { %v853_v41 = vadd.f32 %v1826_v6, %v852_v40  ;;  %946 = vst.msk [vmem:[%s1829_s20 + $0xe0] sm:$0xff] %vm917_vm1, %v908_v1 }
 0x1e6   : > { %924 = vst.msk [vmem:[%s1829_s20 + $0x30] sm:$0xff] %vm917_vm1, %v853_v41 }
 0x1e9   : > { %v909_v3 = vpop.f32.mrf.mxu3 }
 0x1ea   : > { %v910_v5 = vadd.f32 %v1826_v6, %v909_v3 }
 0x1eb   : > { %v854_v42 = vpop.f32.mrf.mxu2 }
 0x1ec   : > { %v855_v20 = vadd.f32 %v1826_v6, %v854_v42  ;;  %947 = vst.msk [vmem:[%s1829_s20 + $0xe8] sm:$0xff] %vm917_vm1, %v910_v5 }
 0x1ee   : > { %925 = vst.msk [vmem:[%s1829_s20 + $0x38] sm:$0xff] %vm917_vm1, %v855_v20 }
 0x1f1   : > { %v912_v7 = vpop.f32.mrf.mxu3 }
 0x1f2   : > { %v913_v9 = vadd.f32 %v1826_v6, %v912_v7 }
 0x1f3   : > { %v857_v43 = vpop.f32.mrf.mxu2 }
 0x1f4   : > { %v858_v45 = vadd.f32 %v1826_v6, %v857_v43  ;;  %948 = vst.msk [vmem:[%s1829_s20 + $0xf0] sm:$0xff] %vm917_vm1, %v913_v9 }
 0x1f6   : > { %926 = vst.msk [vmem:[%s1829_s20 + $0x40] sm:$0xff] %vm917_vm1, %v858_v45 }
 0x1f9   : > { %v914_v11 = vpop.f32.mrf.mxu3 }
 0x1fa   : > { %v915_v13 = vadd.f32 %v1826_v6, %v914_v11 }
 0x1fb   : > { %v859_v46 = vpop.f32.mrf.mxu2 }
 0x1fc   : > { %v860_v48 = vadd.f32 %v1826_v6, %v859_v46  ;;  %949 = vst.msk [vmem:[%s1829_s20 + $0xf8] sm:$0xff] %vm917_vm1, %v915_v13 }
 0x1fe   : > { %927 = vst.msk [vmem:[%s1829_s20 + $0x48] sm:$0xff] %vm917_vm1, %v860_v48 }
 0x203   : > { %v862_v50 = vpop.f32.mrf.mxu2 }
 0x204   : > { %v863_v52 = vadd.f32 %v1826_v6, %v862_v50 }
 0x206   : > { %928 = vst.msk [vmem:[%s1829_s20 + $0x50] sm:$0xff] %vm917_vm1, %v863_v52 }
 0x20b   : > { %v864_v54 = vpop.f32.mrf.mxu2 }
 0x20c   : > { %v865_v56 = vadd.f32 %v1826_v6, %v864_v54 }
 0x20e   : > { %929 = vst.msk [vmem:[%s1829_s20 + $0x58] sm:$0xff] %vm917_vm1, %v865_v56 }
 0x213   : > { %v867_v58 = vpop.f32.mrf.mxu2 }
 0x214   : > { %v868_v60 = vadd.f32 %v1826_v6, %v867_v58 }
 0x216   : > { %930 = vst.msk [vmem:[%s1829_s20 + $0x60] sm:$0xff] %vm917_vm1, %v868_v60 }
 0x21b   : > { %v869_v62 = vpop.f32.mrf.mxu2 }
 0x21c   : > { %v870_v0 = vadd.f32 %v1826_v6, %v869_v62 }
 0x21e   : > { %931 = vst.msk [vmem:[%s1829_s20 + $0x68] sm:$0xff] %vm917_vm1, %v870_v0 }
 0x223   : > { %v872_v2 = vpop.f32.mrf.mxu2 }
 0x224   : > { %v873_v4 = vadd.f32 %v1826_v6, %v872_v2 }
 0x226   : > { %932 = vst.msk [vmem:[%s1829_s20 + $0x70] sm:$0xff] %vm917_vm1, %v873_v4 }
 0x22b   : > { %v874_v44 = vpop.f32.mrf.mxu2 }
 0x22c   : > { %v875_v8 = vadd.f32 %v1826_v6, %v874_v44 }
 0x22e   : > { %933 = vst.msk [vmem:[%s1829_s20 + $0x78] sm:$0xff] %vm917_vm1, %v875_v8 }
 0x233   : > { %v877_v10 = vpop.f32.mrf.mxu2 }
 0x234   : > { %v878_v12 = vadd.f32 %v1826_v6, %v877_v10 }
 0x236   : > { %934 = vst.msk [vmem:[%s1829_s20 + $0x80] sm:$0xff] %vm917_vm1, %v878_v12 }
 0x23b   : > { %v879_v14 = vpop.f32.mrf.mxu2 }
 0x23c   : > { %v880_v15 = vadd.f32 %v1826_v6, %v879_v14 }
 0x23e   : > { %935 = vst.msk [vmem:[%s1829_s20 + $0x88] sm:$0xff] %vm917_vm1, %v880_v15 }
 0x243   : > { %v882_v16 = vpop.f32.mrf.mxu2 }
 0x244   : > { %v883_v17 = vadd.f32 %v1826_v6, %v882_v16 }
 0x246   : > { %936 = vst.msk [vmem:[%s1829_s20 + $0x90] sm:$0xff] %vm917_vm1, %v883_v17 }
 0x24b   : > { %v884_v18 = vpop.f32.mrf.mxu2 }
 0x24c   : > { %v885_v19 = vadd.f32 %v1826_v6, %v884_v18 }
 0x24e   : > { %937 = vst.msk [vmem:[%s1829_s20 + $0x98] sm:$0xff] %vm917_vm1, %v885_v19 }
 0x253   : > { %v887_v21 = vpop.f32.mrf.mxu2 }
 0x254   : > { %v888_v22 = vadd.f32 %v1826_v6, %v887_v21 }
 0x256   : > { %938 = vst.msk [vmem:[%s1829_s20 + $0xa0] sm:$0xff] %vm917_vm1, %v888_v22 }
 0x25b   : > { %v889_v23 = vpop.f32.mrf.mxu2 }
 0x25c   : > { %v890_v24 = vadd.f32 %v1826_v6, %v889_v23 }
 0x25e   : > { %939 = vst.msk [vmem:[%s1829_s20 + $0xa8] sm:$0xff] %vm917_vm1, %v890_v24 }
 0x263   : > { %v892_v25 = vpop.f32.mrf.mxu2 }
 0x264   : > { %v893_v26 = vadd.f32 %v1826_v6, %v892_v25 }
 0x266   : > { %940 = vst.msk [vmem:[%s1829_s20 + $0xb0] sm:$0xff] %vm917_vm1, %v893_v26 }
 0x26a   : > { %956 = sbr.rel (!%p1645_p4) target bundleno = 687 (0x2af), region = 52 }
 0x26b   : > { %v894_v27 = vpop.f32.mrf.mxu2 }
 0x26c   : > { %v895_v28 = vadd.f32 %v1826_v6, %v894_v27 }
 0x26e   : > { %941 = vst.msk [vmem:[%s1829_s20 + $0xb8] sm:$0xff] %vm917_vm1, %v895_v28 }
 0x26f   : > { %s2095_s24 = smov (!%p959_p8, %s958_s24), 32 }
 0x270   : > { %s1371_s29 = sshll.u32 %s2095_s24, 3 }
 0x271   : > { %p1374_p9 = scmp.eq.s32.totalorder %s1371_s29, 0 }
 0x272   : > { %s1948_s30 = sshrl.u32 (!%p1374_p9), %s2095_s24, 5 }
 0x273   : > { %967 = sbr.rel (%p1374_p9) target bundleno = 687 (0x2af), region = 56  ;;  %p1375_p10 = scmp.le.s32.totalorder (!%p1374_p9), %s1948_s30, 0 }
 0x278   : > { %1246 = sbr.rel (%p1375_p10) target bundleno = 670 (0x29e), region = 132  ;;  %s2086_s27 = smov (!%p1375_p10), %s1942_s26 }
 0x279   : > { %s2087_s9 = smov (!%p1375_p10), %s1829_s20  ;;  %s1957_s12 = smov (!%p1375_p10), 0  }
 0x27a   : > { %s1959_s10 = smov (!%p1375_p10), 0  }
 0x27d LB: >> { %v1092_v6 = vld [vmem:[%s1554_s9] sm:$0xff]  ;;  %v1094_v29 = vld [vmem:[%s1554_s9 + $0x8] sm:$0xff]  ;;  %v1096_v30 = vld [vmem:[%s1554_s9 + $0x10] sm:$0xff]  ;;  %s1156_s11 = sadd.s32 1, %s1558_s12  ;;  %s1086_s10 = sadd.s32 1, %s1562_s10   ;;  %s1562_s10 = sphi %s1959_s10, %s1086_s10   ;;  %s1558_s12 = sphi %s1957_s12, %s2090_s12   ;;  %s1554_s9 = sphi %s2087_s9, %s2089_s9   ;;  %s1550_s27 = sphi %s2086_s27, %s2088_s27  }
 0x27e   : >> { %1093 = vst [vmem:[%s1550_s27] sm:$0xff] %v1092_v6  ;;  %v1098_v31 = vld [vmem:[%s1554_s9 + $0x18] sm:$0xff]  ;;  %p1157_p11 = scmp.ge.s32.totalorder %s1156_s11, %s1948_s30  ;;  %v1100_v32 = vld [vmem:[%s1554_s9 + $0x20] sm:$0xff]  ;;  %v1102_v33 = vld [vmem:[%s1554_s9 + $0x28] sm:$0xff]  ;;  %p1085_p12 = scmp.ge.s32.totalorder %s1086_s10, %s1948_s30 }
 0x27f   : >> { %1095 = vst [vmem:[%s1550_s27 + $0x8] sm:$0xff] %v1094_v29  ;;  %v1104_v34 = vld [vmem:[%s1554_s9 + $0x30] sm:$0xff]  ;;  %v1106_v35 = vld [vmem:[%s1554_s9 + $0x38] sm:$0xff]  ;;  %v1108_v36 = vld [vmem:[%s1554_s9 + $0x40] sm:$0xff] }
 0x280   : >> { %1097 = vst [vmem:[%s1550_s27 + $0x10] sm:$0xff] %v1096_v30  ;;  %s2097_s11 = smov (%p1157_p11, %s1156_s11), 0  ;;  %v1110_v37 = vld [vmem:[%s1554_s9 + $0x48] sm:$0xff]  ;;  %v1112_v38 = vld [vmem:[%s1554_s9 + $0x50] sm:$0xff]  ;;  %v1114_v39 = vld [vmem:[%s1554_s9 + $0x58] sm:$0xff] }
 0x281   : >> { %1099 = vst [vmem:[%s1550_s27 + $0x18] sm:$0xff] %v1098_v31  ;;  %s1376_s13 = sshll.u32 %s2097_s11, 8  ;;  %v1116_v40 = vld [vmem:[%s1554_s9 + $0x60] sm:$0xff]  ;;  %v1118_v41 = vld [vmem:[%s1554_s9 + $0x68] sm:$0xff]  ;;  %v1120_v42 = vld [vmem:[%s1554_s9 + $0x70] sm:$0xff]  ;;  %s2090_s12 = smov %s2097_s11 }
 0x282   : >> { %1101 = vst [vmem:[%s1550_s27 + $0x20] sm:$0xff] %v1100_v32  ;;  %s1991_s14 = scalar_lea.vmem %s1829_s20, %s1376_s13 [#allocation2]   ;;  %s1994_s15 = scalar_lea.vmem %s1942_s26, %s1376_s13   ;;  %v1122_v20 = vld [vmem:[%s1554_s9 + $0x78] sm:$0xff]  ;;  %v1124_v43 = vld [vmem:[%s1554_s9 + $0x80] sm:$0xff]  ;;  %v1126_v45 = vld [vmem:[%s1554_s9 + $0x88] sm:$0xff] }
 0x283   : >> { %1103 = vst [vmem:[%s1550_s27 + $0x28] sm:$0xff] %v1102_v33  ;;  %v1128_v46 = vld [vmem:[%s1554_s9 + $0x90] sm:$0xff]  ;;  %v1130_v47 = vld [vmem:[%s1554_s9 + $0x98] sm:$0xff]  ;;  %v1132_v48 = vld [vmem:[%s1554_s9 + $0xa0] sm:$0xff] }
 0x284   : >> { %1105 = vst [vmem:[%s1550_s27 + $0x30] sm:$0xff] %v1104_v34  ;;  %v1134_v49 = vld [vmem:[%s1554_s9 + $0xa8] sm:$0xff]  ;;  %v1136_v50 = vld [vmem:[%s1554_s9 + $0xb0] sm:$0xff]  ;;  %v1138_v51 = vld [vmem:[%s1554_s9 + $0xb8] sm:$0xff] }
 0x285   : >> { %1107 = vst [vmem:[%s1550_s27 + $0x38] sm:$0xff] %v1106_v35  ;;  %v1140_v52 = vld [vmem:[%s1554_s9 + $0xc0] sm:$0xff]  ;;  %v1142_v53 = vld [vmem:[%s1554_s9 + $0xc8] sm:$0xff]  ;;  %v1144_v54 = vld [vmem:[%s1554_s9 + $0xd0] sm:$0xff] }
 0x286   : >> { %1109 = vst [vmem:[%s1550_s27 + $0x40] sm:$0xff] %v1108_v36  ;;  %v1146_v55 = vld [vmem:[%s1554_s9 + $0xd8] sm:$0xff]  ;;  %v1148_v56 = vld [vmem:[%s1554_s9 + $0xe0] sm:$0xff]  ;;  %v1150_v57 = vld [vmem:[%s1554_s9 + $0xe8] sm:$0xff] }
 0x287   : >> { %1111 = vst [vmem:[%s1550_s27 + $0x48] sm:$0xff] %v1110_v37  ;;  %v1152_v58 = vld [vmem:[%s1554_s9 + $0xf0] sm:$0xff]  ;;  %v1154_v59 = vld [vmem:[%s1554_s9 + $0xf8] sm:$0xff]  ;;  %s2089_s9 = smov %s1991_s14 }
 0x288   : >> { %1113 = vst [vmem:[%s1550_s27 + $0x50] sm:$0xff] %v1112_v38 }
 0x289   : >> { %1115 = vst [vmem:[%s1550_s27 + $0x58] sm:$0xff] %v1114_v39 }
 0x28a   : >> { %1117 = vst [vmem:[%s1550_s27 + $0x60] sm:$0xff] %v1116_v40 }
 0x28b   : >> { %1119 = vst [vmem:[%s1550_s27 + $0x68] sm:$0xff] %v1118_v41 }
 0x28c   : >> { %1121 = vst [vmem:[%s1550_s27 + $0x70] sm:$0xff] %v1120_v42 }
 0x28d   : >> { %1123 = vst [vmem:[%s1550_s27 + $0x78] sm:$0xff] %v1122_v20 }
 0x28e   : >> { %1125 = vst [vmem:[%s1550_s27 + $0x80] sm:$0xff] %v1124_v43 }
 0x28f   : >> { %1127 = vst [vmem:[%s1550_s27 + $0x88] sm:$0xff] %v1126_v45 }
 0x290   : >> { %1129 = vst [vmem:[%s1550_s27 + $0x90] sm:$0xff] %v1128_v46 }
 0x291   : >> { %1131 = vst [vmem:[%s1550_s27 + $0x98] sm:$0xff] %v1130_v47 }
 0x292   : >> { %1133 = vst [vmem:[%s1550_s27 + $0xa0] sm:$0xff] %v1132_v48 }
 0x293   : >> { %1135 = vst [vmem:[%s1550_s27 + $0xa8] sm:$0xff] %v1134_v49 }
 0x294   : >> { %1137 = vst [vmem:[%s1550_s27 + $0xb0] sm:$0xff] %v1136_v50 }
 0x295   : >> { %1139 = vst [vmem:[%s1550_s27 + $0xb8] sm:$0xff] %v1138_v51 }
 0x296   : >> { %1141 = vst [vmem:[%s1550_s27 + $0xc0] sm:$0xff] %v1140_v52 }
 0x297   : >> { %1143 = vst [vmem:[%s1550_s27 + $0xc8] sm:$0xff] %v1142_v53 }
 0x298   : >> { %1145 = vst [vmem:[%s1550_s27 + $0xd0] sm:$0xff] %v1144_v54 }
 0x299   : >> { %1147 = vst [vmem:[%s1550_s27 + $0xd8] sm:$0xff] %v1146_v55  ;;  %1088 = sbr.rel (!%p1085_p12) target bundleno = 637 (0x27d), region = 138 }
 0x29a   : >> { %1149 = vst [vmem:[%s1550_s27 + $0xe0] sm:$0xff] %v1148_v56 }
 0x29b   : >> { %1151 = vst [vmem:[%s1550_s27 + $0xe8] sm:$0xff] %v1150_v57 }
 0x29c   : >> { %1153 = vst [vmem:[%s1550_s27 + $0xf0] sm:$0xff] %v1152_v58 }
 0x29d   : >> { %1155 = vst [vmem:[%s1550_s27 + $0xf8] sm:$0xff] %v1154_v59  ;;  %s2088_s27 = smov %s1994_s15 }
 0x29e PF: > { %s2059_s16 = sand.u32 31, %s2095_s24   ;;  %s1393_s17 = sshll.u32 %s1948_s30, 8 }
 0x29f   : > { %s1167_s18 = scalar_lea.vmem %s1829_s20, %s1393_s17 [#allocation2]   ;;  %s1169_s19 = scalar_lea.vmem %s1942_s26, %s1393_s17  }
 0x2a0   : > { %p1381_p13 = scmp.le.s32.totalorder %s2059_s16, 0 }
 0x2a1   : > { %s1564_s21 = smov (!%p1381_p13), %s1169_s19   ;;  %s1568_s22 = smov (!%p1381_p13), %s1167_s18  }
 0x2a2   : > { %1260 = sbr.rel (%p1381_p13) target bundleno = 687 (0x2af), region = 143  ;;  %s1572_s23 = smov (!%p1381_p13), 0  }
 0x2a3   : > { %s1576_s29 = smov (!%p1381_p13), 0  }
 0x2a7 LB: >> { %v1179_v60 = vld [vmem:[%s1570_s22] sm:$0xff]  ;;  %s1181_s24 = sadd.s32 1, %s1574_s23  ;;  %s1173_s29 = sadd.s32 1, %s1578_s29   ;;  %s1578_s29 = sphi %s1576_s29, %s1173_s29   ;;  %s1574_s23 = sphi %s1572_s23, %s1573_s23   ;;  %s1570_s22 = sphi %s1568_s22, %s1186_s22   ;;  %s1566_s21 = sphi %s1564_s21, %s1187_s21  }
 0x2a8   : >> { %1180 = vst [vmem:[%s1566_s21] sm:$0xff] %v1179_v60  ;;  %p1182_p0 = scmp.ge.s32.totalorder %s1181_s24, %s2059_s16  ;;  %p1172_p1 = scmp.ge.s32.totalorder %s1173_s29, %s2059_s16 }
 0x2aa   : >> { %s2099_s24 = smov (%p1182_p0, %s1181_s24), 0  ;;  %1175 = sbr.rel (!%p1172_p1) target bundleno = 679 (0x2a7), region = 149 }
 0x2ab   : >> { %s1382_s20 = sshll.u32 %s2099_s24, 3  ;;  %s1573_s23 = smov %s2099_s24  }
 0x2ac   : >> { %s1186_s22 = scalar_lea.vmem %s1167_s18, %s1382_s20 [#allocation2]   ;;  %s1187_s21 = scalar_lea.vmem %s1169_s19, %s1382_s20  }
 0x2af PF: > { %p14_p2 = scmp.ge.s32.totalorder %s1635_s28, 6   ;;  %s2091_s24 = smov %s1542_s25 }
 0x2b0   : > { %s2092_s25 = smov %s1643_s8  ;;  %s2093_s26 = smov %s1635_s28 }
 0x2b1   :  { %16 = sbr.rel (!%p14_p2) target bundleno = 2 (0x2), region = 160 }

</bundles_post_ra>
